<compile_context>
chip_gen: v7x
topology: tpu7x:2x2x1
jax: 0.10.0
libtpu: 0.0.40
codegen_flags: <defaults>
</compile_context>

<pallas_src>
import jax
import jax.numpy as jnp
from jax.experimental import pallas as pl
from jax.experimental.pallas import tpu as pltpu

LANE = 128  # padded lane width for hidden/output feature dimensions


def _round_up(x, m):
    return (x + m - 1) // m * m


def _cdiv(a, b):
    return -(-a // b)


def _pad2(a, rows, cols):
    """Zero-pad a 2-D array up to (rows, cols)."""
    return jnp.pad(a, ((0, rows - a.shape[0]), (0, cols - a.shape[1])))


def _mlp_kernel(x_ref, w1_ref, wr_ref, b_ref, o_ref):
    """Fused Linear->Tanh x3 -> Linear on one batch block; everything in VMEM.

    x_ref : (block_b, n_in)  native (unpadded) feature width
    w1_ref: (n_in, 128)      layer-1 weight, out-dim zero-padded to 128 lanes
    wr_ref: (3, 128, 128)    layers 2..4 weights, zero-padded to 128x128
    b_ref : (8, 128)         rows 0..3 = b1..b4 (lane-padded); rows 4..7 unused
    o_ref : (block_b, 128)   lane-dense output; real 10 cols sliced by caller
    """
    x = x_ref[...]

    h = jnp.tanh(jnp.dot(x, w1_ref[...], preferred_element_type=jnp.float32)
                 + b_ref[0:1, :])
    h = jnp.tanh(jnp.dot(h, wr_ref[0], preferred_element_type=jnp.float32)
                 + b_ref[1:2, :])
    h = jnp.tanh(jnp.dot(h, wr_ref[1], preferred_element_type=jnp.float32)
                 + b_ref[2:3, :])
    out = (jnp.dot(h, wr_ref[2], preferred_element_type=jnp.float32)
           + b_ref[3:4, :])

    o_ref[...] = out.astype(o_ref.dtype)


def prepare_padded_params(params):
    """One-time padding/stacking of parameters (hoisted out of the hot path)."""
    n_in = params["w1"].shape[0]
    out_dim = params["w4"].shape[1]
    w1 = _pad2(params["w1"].astype(jnp.float32), n_in, LANE)            # (n_in,128)
    w_rest = jnp.stack([
        _pad2(params["w2"].astype(jnp.float32), LANE, LANE),
        _pad2(params["w3"].astype(jnp.float32), LANE, LANE),
        _pad2(params["w4"].astype(jnp.float32), LANE, LANE)])           # (3,128,128)
    b_stack = jnp.zeros((8, LANE), jnp.float32)
    for i in range(4):
        b = params[f"b{i + 1}"].astype(jnp.float32).reshape(-1)
        b_stack = b_stack.at[i, :b.shape[0]].set(b)                     # (8,128)
    return {"w1": w1, "w_rest": w_rest, "b_stack": b_stack,
            "n_in": n_in, "out_dim": out_dim}


def process_player_forward(x, padded, *, block_b=512, trim_output=True):
    """Forward pass of ProcessPlayerModule via a fused Pallas kernel.

    x:      (B, n_in) float32
    padded: output of prepare_padded_params (pre-padded, stacked weights)
    Returns (B, 10) float32 (or the padded (B_pad, 128) slab if trim_output=False).
    """
    B, n_in = x.shape
    assert padded["n_in"] == n_in, (padded["n_in"], n_in)
    out_dim = padded["out_dim"]

    # ---- batch blocking: big blocks; even block count for the 2-TC split ----
    bb = max(8, min(block_b, _round_up(B, 8)))
    nb = _cdiv(B, bb)
    if nb > 1 and nb % 2 == 1:
        # Make the block count even so dimension_semantics=("parallel",) splits
        # the batch evenly across v7x's two TensorCores.
        bb = _round_up(_cdiv(B, nb + 1), 8)
        nb = _cdiv(B, bb)
    B_pad = nb * bb

    x_p = x.astype(jnp.float32)
    if B_pad != B:
        x_p = jnp.pad(x_p, ((0, B_pad - B), (0, 0)))   # rows only; lanes stay native

    w1, w_rest, b_stack = padded["w1"], padded["w_rest"], padded["b_stack"]

    # ---- block specs: x/out pipelined over the batch grid, params resident ----
    x_spec = pl.BlockSpec((bb, n_in), lambda i: (i, 0))
    w1_spec = pl.BlockSpec((n_in, LANE), lambda i: (0, 0))
    wr_spec = pl.BlockSpec((3, LANE, LANE), lambda i: (0, 0, 0))
    b_spec = pl.BlockSpec((8, LANE), lambda i: (0, 0))
    o_spec = pl.BlockSpec((bb, LANE), lambda i: (i, 0))

    # ---- advisory cost estimate for the XLA scheduler ----
    flops = 2 * B_pad * (n_in * LANE + 3 * LANE * LANE)
    transcendentals = 3 * B_pad * LANE
    bytes_accessed = 4 * (x_p.size + w1.size + w_rest.size + b_stack.size
                          + B_pad * LANE)
    cost = pl.CostEstimate(flops=flops,
                           transcendentals=transcendentals,
                           bytes_accessed=bytes_accessed)

    out_padded = pl.pallas_call(
        _mlp_kernel,
        out_shape=jax.ShapeDtypeStruct((B_pad, LANE), jnp.float32),
        grid_spec=pltpu.PrefetchScalarGridSpec(
            num_scalar_prefetch=0,
            grid=(nb,),
            in_specs=[x_spec, w1_spec, wr_spec, b_spec],
            out_specs=o_spec),
        compiler_params=pltpu.CompilerParams(
            dimension_semantics=("parallel",)),
        cost_estimate=cost,
    )(x_p, w1, w_rest, b_stack)

    if not trim_output:
        return out_padded
    return out_padded[:B, :out_dim]


def init_params(key, n_in):
    """Deterministic init mimicking PyTorch nn.Linear default U(-1/sqrt(fan_in), +)."""
    dims = [(n_in, 50), (50, 32), (32, 16), (16, 10)]
    params = {}
    keys = jax.random.split(key, 2 * len(dims))
    for i, (fan_in, fan_out) in enumerate(dims):
        bound = 1.0 / jnp.sqrt(float(fan_in))
        w = jax.random.uniform(keys[2 * i], (fan_in, fan_out),
                               minval=-bound, maxval=bound, dtype=jnp.float32)
        b = jax.random.uniform(keys[2 * i + 1], (1, fan_out),
                               minval=-bound, maxval=bound, dtype=jnp.float32)
        params[f"w{i + 1}"] = w
        params[f"b{i + 1}"] = b
    return params


def reference_forward(x, params):
    """Pure-JAX reference of the same forward pass (unpadded)."""
    h = jnp.tanh(x @ params["w1"] + params["b1"])
    h = jnp.tanh(h @ params["w2"] + params["b2"])
    h = jnp.tanh(h @ params["w3"] + params["b3"])
    return h @ params["w4"] + params["b4"]


if __name__ == "__main__":
    # Synthetic env: 2 players, n_sins = 4 -> n_in = 2 + 6 + 4*2*4 = 40
    n_players = 2
    n_sins = 4
    n_in = n_players + 6 + n_sins * 2 * 4
    batch = 8

    key = jax.random.PRNGKey(0)
    k_x, k_p = jax.random.split(key)
    x = jax.random.normal(k_x, (batch, n_in), dtype=jnp.float32)
    params = init_params(k_p, n_in)

    # Pad / stack parameters ONCE (hoisted out of the per-call path).
    padded = jax.block_until_ready(prepare_padded_params(params))

    out = jax.block_until_ready(process_player_forward(x, padded))
    ref = reference_forward(x, params)
    assert out.shape == (batch, 10), out.shape
    assert jnp.allclose(out, ref, atol=1e-5, rtol=1e-5), "mismatch vs reference"

    # Single-block path with row padding (B=300 -> one 304-row block).
    big_B = 300
    xb = jax.random.normal(jax.random.PRNGKey(1), (big_B, n_in), dtype=jnp.float32)
    out_big = jax.block_until_ready(process_player_forward(xb, padded))
    ref_big = reference_forward(xb, params)
    assert out_big.shape == (big_B, 10), out_big.shape
    assert jnp.allclose(out_big, ref_big, atol=1e-5, rtol=1e-5), "mismatch (big batch)"

    # Multi-block path: force several blocks and exercise the even-split
    # adjustment (B=300, block_b=128 -> 4 blocks of 80 rows).
    out_grid = jax.block_until_ready(
        process_player_forward(xb, padded, block_b=128))
    assert out_grid.shape == (big_B, 10), out_grid.shape
    assert jnp.allclose(out_grid, ref_big, atol=1e-5, rtol=1e-5), "mismatch (gridded)"

    print("KERNEL_OK")
</pallas_src>

<mosaic_0001>
module attributes {stable_mosaic.version = 11 : i64} {
  func.func @_mlp_kernel(%arg0: i32, %arg1: memref<8x40xf32, #tpu.memory_space<vmem>>, %arg2: memref<40x128xf32, #tpu.memory_space<vmem>>, %arg3: memref<3x128x128xf32, #tpu.memory_space<vmem>>, %arg4: memref<8x128xf32, #tpu.memory_space<vmem>>, %arg5: memref<8x128xf32, #tpu.memory_space<vmem>>) attributes {dimension_semantics = [#tpu.dimension_semantics<parallel>], iteration_bounds = array<i64: 1>, scalar_prefetch = 0 : i64, scratch_operands = 0 : i64, tpu.core_type = #tpu.core_type<tc>, window_params = [{transform_indices = @transform_0, window_bounds = array<i64: 8, 40>}, {pipeline_mode = #tpu.pipeline_mode<synchronous>, transform_indices = @transform_1, window_bounds = array<i64: 40, 128>}, {pipeline_mode = #tpu.pipeline_mode<synchronous>, transform_indices = @transform_2, window_bounds = array<i64: 3, 128, 128>}, {pipeline_mode = #tpu.pipeline_mode<synchronous>, transform_indices = @transform_3, window_bounds = array<i64: 8, 128>}, {transform_indices = @transform_4, window_bounds = array<i64: 8, 128>}]} {
    %c0 = arith.constant 0 : index
    %c0_0 = arith.constant 0 : index
    %0 = vector.load %arg1[%c0, %c0_0] : memref<8x40xf32, #tpu.memory_space<vmem>>, vector<8x40xf32>
    %c0_1 = arith.constant 0 : index
    %c0_2 = arith.constant 0 : index
    %1 = vector.load %arg2[%c0_1, %c0_2] : memref<40x128xf32, #tpu.memory_space<vmem>>, vector<40x128xf32>
    %cst = arith.constant dense<0.000000e+00> : vector<8x128xf32>
    %2 = tpu.matmul %0, %1, %cst {dimension_numbers = #tpu.dot_dimension_numbers<[1], [0], [0], [1], [0, 0, 1, 1], [], []>} : vector<8x40xf32>, vector<40x128xf32>, vector<8x128xf32> -> vector<8x128xf32>
    %c0_3 = arith.constant 0 : index
    %c0_4 = arith.constant 0 : index
    %3 = vector.load %arg4[%c0_3, %c0_4] : memref<8x128xf32, #tpu.memory_space<vmem>>, vector<1x128xf32>
    %4 = vector.broadcast %3 : vector<1x128xf32> to vector<8x128xf32>
    %5 = arith.addf %2, %4 : vector<8x128xf32>
    %6 = math.tanh %5 : vector<8x128xf32>
    %c0_5 = arith.constant 0 : index
    %c0_6 = arith.constant 0 : index
    %c0_7 = arith.constant 0 : index
    %7 = vector.load %arg3[%c0_5, %c0_6, %c0_7] : memref<3x128x128xf32, #tpu.memory_space<vmem>>, vector<1x128x128xf32>
    %8 = vector.shape_cast %7 : vector<1x128x128xf32> to vector<128x128xf32>
    %cst_8 = arith.constant dense<0.000000e+00> : vector<8x128xf32>
    %9 = tpu.matmul %6, %8, %cst_8 {dimension_numbers = #tpu.dot_dimension_numbers<[1], [0], [0], [1], [0, 0, 1, 1], [], []>} : vector<8x128xf32>, vector<128x128xf32>, vector<8x128xf32> -> vector<8x128xf32>
    %c1 = arith.constant 1 : index
    %c0_9 = arith.constant 0 : index
    %10 = vector.load %arg4[%c1, %c0_9] : memref<8x128xf32, #tpu.memory_space<vmem>>, vector<1x128xf32>
    %11 = vector.broadcast %10 : vector<1x128xf32> to vector<8x128xf32>
    %12 = arith.addf %9, %11 : vector<8x128xf32>
    %13 = math.tanh %12 : vector<8x128xf32>
    %c1_10 = arith.constant 1 : index
    %c0_11 = arith.constant 0 : index
    %c0_12 = arith.constant 0 : index
    %14 = vector.load %arg3[%c1_10, %c0_11, %c0_12] : memref<3x128x128xf32, #tpu.memory_space<vmem>>, vector<1x128x128xf32>
    %15 = vector.shape_cast %14 : vector<1x128x128xf32> to vector<128x128xf32>
    %cst_13 = arith.constant dense<0.000000e+00> : vector<8x128xf32>
    %16 = tpu.matmul %13, %15, %cst_13 {dimension_numbers = #tpu.dot_dimension_numbers<[1], [0], [0], [1], [0, 0, 1, 1], [], []>} : vector<8x128xf32>, vector<128x128xf32>, vector<8x128xf32> -> vector<8x128xf32>
    %c2 = arith.constant 2 : index
    %c0_14 = arith.constant 0 : index
    %17 = vector.load %arg4[%c2, %c0_14] : memref<8x128xf32, #tpu.memory_space<vmem>>, vector<1x128xf32>
    %18 = vector.broadcast %17 : vector<1x128xf32> to vector<8x128xf32>
    %19 = arith.addf %16, %18 : vector<8x128xf32>
    %20 = math.tanh %19 : vector<8x128xf32>
    %c2_15 = arith.constant 2 : index
    %c0_16 = arith.constant 0 : index
    %c0_17 = arith.constant 0 : index
    %21 = vector.load %arg3[%c2_15, %c0_16, %c0_17] : memref<3x128x128xf32, #tpu.memory_space<vmem>>, vector<1x128x128xf32>
    %22 = vector.shape_cast %21 : vector<1x128x128xf32> to vector<128x128xf32>
    %cst_18 = arith.constant dense<0.000000e+00> : vector<8x128xf32>
    %23 = tpu.matmul %20, %22, %cst_18 {dimension_numbers = #tpu.dot_dimension_numbers<[1], [0], [0], [1], [0, 0, 1, 1], [], []>} : vector<8x128xf32>, vector<128x128xf32>, vector<8x128xf32> -> vector<8x128xf32>
    %c3 = arith.constant 3 : index
    %c0_19 = arith.constant 0 : index
    %24 = vector.load %arg4[%c3, %c0_19] : memref<8x128xf32, #tpu.memory_space<vmem>>, vector<1x128xf32>
    %25 = vector.broadcast %24 : vector<1x128xf32> to vector<8x128xf32>
    %26 = arith.addf %23, %25 : vector<8x128xf32>
    %c0_20 = arith.constant 0 : index
    %c0_21 = arith.constant 0 : index
    %27 = vector.load %arg5[%c0_20, %c0_21] : memref<8x128xf32, #tpu.memory_space<vmem>>, vector<8x128xf32>
    tpu.vector_store %arg5[%c0_20, %c0_21], %26 {strides = array<i32>} : memref<8x128xf32, #tpu.memory_space<vmem>>, vector<8x128xf32>,
    return
  }
  func.func @transform_0(%arg0: i32) -> (i32, i32) {
    %c0_i32 = arith.constant 0 : i32
    %c0_i32_0 = arith.constant 0 : i32
    return %arg0, %c0_i32 : i32, i32
  }
  func.func @transform_1(%arg0: i32) -> (i32, i32) {
    %c0_i32 = arith.constant 0 : i32
    %c0_i32_0 = arith.constant 0 : i32
    %c0_i32_1 = arith.constant 0 : i32
    return %c0_i32, %c0_i32_0 : i32, i32
  }
  func.func @transform_2(%arg0: i32) -> (i32, i32, i32) {
    %c0_i32 = arith.constant 0 : i32
    %c0_i32_0 = arith.constant 0 : i32
    %c0_i32_1 = arith.constant 0 : i32
    %c0_i32_2 = arith.constant 0 : i32
    return %c0_i32, %c0_i32_0, %c0_i32_1 : i32, i32, i32
  }
  func.func @transform_3(%arg0: i32) -> (i32, i32) {
    %c0_i32 = arith.constant 0 : i32
    %c0_i32_0 = arith.constant 0 : i32
    %c0_i32_1 = arith.constant 0 : i32
    return %c0_i32, %c0_i32_0 : i32, i32
  }
  func.func @transform_4(%arg0: i32) -> (i32, i32) {
    %c0_i32 = arith.constant 0 : i32
    %c0_i32_0 = arith.constant 0 : i32
    return %arg0, %c0_i32 : i32, i32
  }
}

</mosaic_0001>

<bundles_post_ra>
// kernel: tpu_custom_call.1
= control target key start
LH: loop header
LB: loop body
LE: loop exit
PB: predicated region body
PF: predicated region fallthrough
CT: control target
= control target key end

     0   :  { %9 = vsyncpa [#allocation3], 0  ;;  %s939_s0 = inlined_call_operand.hbm [shape: f32[8,40], index: 0, kind: input, shape index: {}]   ;;  %s940_s1 = inlined_call_operand.hbm [shape: f32[40,128], index: 1, kind: input, shape index: {}]   ;;  %s941_s2 = inlined_call_operand.hbm [shape: f32[3,128,128], index: 2, kind: input, shape index: {}]   ;;  %s942_s3 = inlined_call_operand.vmem [shape: f32[8,128], index: 3, kind: input, shape index: {}]   ;;  %s943_s4 = inlined_call_operand.hbm [shape: f32[8,128], index: 4, kind: output, shape index: {}]  }
   0x1   :  { %10 = vsyncpa [#allocation6], 0 }
   0x2   :  { %11 = vsyncpa [#allocation4], 0  ;;  %s804_s15 = smov [#allocation5]   ;;  %s710_s19 = scalar_lea.hbm %s940_s1, 640 }
   0x3   :  { %s27_s16 = sshll.u32 %s804_s15, 4  ;;  %p711_p0 = scmp.ne.s32.totalorder %s940_s1, %s710_s19  ;;  %s28_s16 = int_to_ptr.vmem [resolvable:$true] %s27_s16 }
   0x4   :  { %p714_p1 = scmp.lt.u32.totalorder %s710_s19, %s940_s1 }
   0x6   :  { %p716_p2 = pnand %p714_p1, %p711_p0 }
   0x8   :  { %719 = shalt.err (!%p716_p2)
}
   0x9   :  { %s720_s24 = scalar_lea.vmem %s28_s16, 640  ;;  %p725_p4 = scmp.lt.s32.totalorder %s28_s16, %s28_s16 }
   0xa   :  { %p721_p3 = scmp.ne.s32.totalorder %s28_s16, %s720_s24  ;;  %p726_p5 = scmp.lt.s32.totalorder %s720_s24, %s720_s24 }
   0xc   :  { %p727_p6 = por %p726_p5, %p725_p4 }
   0xe   :  { %p728_p7 = pnand %p727_p6, %p721_p3 }
  0x10   :  { %731 = shalt.err (!%p728_p7)
}
  0x11   :  { %s805_s25 = smov 128   ;;  %s806_s26 = smov 8  }
  0x12   :  { %33 = dma.hbm_to_vmem [thread:$0]  %s940_s1, 640, %s28_s16, [#allocation6], %s805_s25, %s805_s25, %s806_s26  }
  0x13   :  { %s807_s29 = smov [#allocation2]   ;;  %s808_s5 = smov [#allocation7]  }
  0x14   :  { %s18_s30 = sshll.u32 %s807_s29, 4  ;;  %s39_s6 = sshll.u32 %s808_s5, 4  ;;  %s19_s30 = int_to_ptr.vmem [resolvable:$true] %s18_s30  ;;  %s40_s6 = int_to_ptr.vmem [resolvable:$true] %s39_s6 }
  0x15   :  { %s732_s9 = scalar_lea.hbm %s939_s0, 128 }
  0x16   :  { %p733_p8 = scmp.ne.s32.totalorder %s939_s0, %s732_s9  ;;  %p736_p9 = scmp.lt.u32.totalorder %s732_s9, %s939_s0 }
  0x18   :  { %p738_p10 = pnand %p736_p9, %p733_p8 }
  0x1a   :  { %741 = shalt.err (!%p738_p10)
}
  0x1b   :  { %s742_s1 = scalar_lea.vmem %s19_s30, 128  ;;  %p747_p12 = scmp.lt.s32.totalorder %s19_s30, %s19_s30 }
  0x1c   :  { %p743_p11 = scmp.ne.s32.totalorder %s19_s30, %s742_s1  ;;  %p748_p13 = scmp.lt.s32.totalorder %s742_s1, %s742_s1 }
  0x1e   :  { %p749_p0 = por %p748_p13, %p747_p12 }
  0x20   :  { %p750_p1 = pnand %p749_p0, %p743_p11 }
  0x22   :  { %753 = shalt.err (!%p750_p1)
}
  0x23   :  { %21 = dma.hbm_to_vmem [thread:$0]  %s939_s0, 128, %s19_s30, [#allocation3]  }
  0x24   :  { %s754_s18 = scalar_lea.hbm %s941_s2, 6144 }
  0x25   :  { %p755_p2 = scmp.ne.s32.totalorder %s941_s2, %s754_s18  ;;  %p758_p3 = scmp.lt.u32.totalorder %s754_s18, %s941_s2 }
  0x27   :  { %p760_p4 = pnand %p758_p3, %p755_p2 }
  0x29   :  { %763 = shalt.err (!%p760_p4)
}
  0x2a   :  { %s764_s23 = scalar_lea.vmem %s40_s6, 6144  ;;  %p769_p6 = scmp.lt.s32.totalorder %s40_s6, %s40_s6 }
  0x2b   :  { %p765_p5 = scmp.ne.s32.totalorder %s40_s6, %s764_s23  ;;  %p770_p7 = scmp.lt.s32.totalorder %s764_s23, %s764_s23 }
  0x2d   :  { %p771_p8 = por %p770_p7, %p769_p6 }
  0x2f   :  { %p772_p9 = pnand %p771_p8, %p765_p5 }
  0x31   :  { %775 = shalt.err (!%p772_p9)
}
  0x32   :  { %45 = dma.hbm_to_vmem [thread:$0]  %s941_s2, 6144, %s40_s6, [#allocation6], %s805_s25, %s805_s25, %s806_s26  }
  0x33   :  { %798 = dma.done.wait [#allocation3], 128  }
  0x34   :  { %799 = vsyncadd [#allocation3], 4294967168 }
  0x35   :  { %800 = dma.done.wait [#allocation6], 6784  }
  0x36   :  { %801 = vsyncadd [#allocation6], 4294960512  ;;  %v809_v0 = vmov 0.0|0.0   ;;  %vm810_vm0 = vmmov 0   ;;  %v811_v1 = vmov 0.0   ;;  %v58_v2 = vld [vmem:[#allocation5] sm:$0xff] }
  0x37   :  { %617 = vmatprep.subr.bf16.mxu0 %v809_v0  ;;  %509 = vmatprep.mubr.msk.f32.mxu0 %vm810_vm0, %v811_v1  ;;  %v59_v3 = vld [vmem:[#allocation5 + $0x8] sm:$0xff]  ;;  %v60_v4 = vld [vmem:[#allocation5 + $0x10] sm:$0xff]  ;;  %v61_v6 = vld [vmem:[#allocation5 + $0x18] sm:$0xff]  ;;  %vm68_vm1 = vcmask 326656   ;;  %s812_s6 = smov [#allocation8]  }
  0x38   :  { %623 = vmatprep.subr.bf16.mxu1 %v809_v0  ;;  %544 = vmatprep.mubr.msk.f32.mxu1 %vm810_vm0, %v811_v1  ;;  %v618_v5 = vpack.c.bf16 %v59_v3, %v58_v2  ;;  %v143_v7 = vld [vmem:[#allocation7] sm:$0xff]  ;;  %v144_v8 = vld [vmem:[#allocation7 + $0x8] sm:$0xff]  ;;  %v145_v9 = vld [vmem:[#allocation7 + $0x10] sm:$0xff]  ;;  %v621_v10 = vpack.c.bf16 %v61_v6, %v60_v4  ;;  %s427_s7 = sshll.u32 %s812_s6, 4  ;;  %s428_s7 = int_to_ptr.vmem [resolvable:$true] %s427_s7 }
  0x39   :  { %v624_v11 = vpack.c.bf16 %v144_v8, %v143_v7  ;;  %v146_v12 = vld [vmem:[#allocation7 + $0x18] sm:$0xff]  ;;  %v147_v14 = vld [vmem:[#allocation7 + $0x20] sm:$0xff]  ;;  %v148_v15 = vld [vmem:[#allocation7 + $0x28] sm:$0xff]  ;;  %s776_s8 = scalar_lea.vmem %s428_s7, 128  ;;  %p781_p11 = scmp.lt.s32.totalorder %s428_s7, %s428_s7 }
  0x3a   :  { %619 = vmatpush3.bf16.msra.mxu0 %v618_v5  ;;  %v627_v13 = vpack.c.bf16 %v146_v12, %v145_v9  ;;  %v62_v16 = vld [vmem:[#allocation5 + $0x20] sm:$0xff]  ;;  %v57_v17 = vld [vmem:[#allocation2] sm:$0xff]  ;;  %v630_v18 = vpack.c.bf16 %v148_v15, %v147_v14  ;;  %v151_v22 = vld [vmem:[#allocation7 + $0x40] sm:$0xff]  ;;  %p777_p10 = scmp.ne.s32.totalorder %s428_s7, %s776_s8  ;;  %p782_p12 = scmp.lt.s32.totalorder %s776_s8, %s776_s8 }
  0x3b   :  { %620 = vmatprep.subr.bf16.mxu0 %v809_v0  ;;  %625 = vmatpush3.bf16.msra.mxu1 %v624_v11  ;;  %v149_v19 = vld [vmem:[#allocation7 + $0x30] sm:$0xff]  ;;  %v150_v20 = vld [vmem:[#allocation7 + $0x38] sm:$0xff]  ;;  %v152_v23 = vld [vmem:[#allocation7 + $0x48] sm:$0xff] }
  0x3c   :  { %626 = vmatprep.subr.bf16.mxu1 %v809_v0  ;;  %v633_v21 = vpack.c.bf16 %v150_v20, %v149_v19  ;;  %v636_v24 = vpack.c.bf16 %v152_v23, %v151_v22  ;;  %v153_v25 = vld [vmem:[#allocation7 + $0x50] sm:$0xff]  ;;  %v154_v26 = vld [vmem:[#allocation7 + $0x58] sm:$0xff]  ;;  %v155_v28 = vld [vmem:[#allocation7 + $0x60] sm:$0xff]  ;;  %p783_p13 = por %p782_p12, %p781_p11 }
  0x3d   :  { %v639_v27 = vpack.c.bf16 %v154_v26, %v153_v25  ;;  %v156_v29 = vld [vmem:[#allocation7 + $0x68] sm:$0xff]  ;;  %v157_v31 = vld [vmem:[#allocation7 + $0x70] sm:$0xff]  ;;  %v158_v32 = vld [vmem:[#allocation7 + $0x78] sm:$0xff] }
  0x3e   :  { %622 = vmatpush3.bf16.msra.mxu0 %v621_v10  ;;  %v642_v30 = vpack.c.bf16 %v156_v29, %v155_v28  ;;  %v645_v33 = vpack.c.bf16 %v158_v32, %v157_v31  ;;  %v236_v34 = vld [vmem:[#allocation7 + $0x80] sm:$0xff]  ;;  %v237_v35 = vld [vmem:[#allocation7 + $0x88] sm:$0xff]  ;;  %v238_v36 = vld [vmem:[#allocation7 + $0x90] sm:$0xff]  ;;  %p784_p0 = pnand %p783_p13, %p777_p10 }
  0x3f   :  { %507 = vmatprep.subr.mxu0 %v811_v1  ;;  %628 = vmatpush3.bf16.msra.mxu1 %v627_v13  ;;  %v648_v37 = vpack.c.bf16 %v237_v35, %v236_v34  ;;  %v239_v38 = vld [vmem:[#allocation7 + $0x98] sm:$0xff]  ;;  %v240_v40 = vld [vmem:[#allocation7 + $0xa0] sm:$0xff]  ;;  %v241_v41 = vld [vmem:[#allocation7 + $0xa8] sm:$0xff] }
  0x40   :  { %629 = vmatprep.subr.bf16.mxu1 %v809_v0  ;;  %v651_v39 = vpack.c.bf16 %v239_v38, %v238_v36  ;;  %v654_v42 = vpack.c.bf16 %v241_v41, %v240_v40  ;;  %v242_v43 = vld [vmem:[#allocation7 + $0xb0] sm:$0xff]  ;;  %v243_v44 = vld [vmem:[#allocation7 + $0xb8] sm:$0xff]  ;;  %v244_v46 = vld [vmem:[#allocation7 + $0xc0] sm:$0xff] }
  0x41   :  { %v657_v45 = vpack.c.bf16 %v243_v44, %v242_v43  ;;  %v245_v47 = vld [vmem:[#allocation7 + $0xc8] sm:$0xff]  ;;  %v437_v49 = vld [vmem:[%s942_s3] ss:$0 sm:$0xff]  ;;  %v247_v55 = vld [vmem:[#allocation7 + $0xd8] sm:$0xff] }
  0x42   :  { %508 = vmatpush3.msra.mxu0 %v62_v16  ;;  %v660_v48 = vpack.c.bf16 %v245_v47, %v244_v46  ;;  %v246_v54 = vld [vmem:[#allocation7 + $0xd0] sm:$0xff]  ;;  %v248_v57 = vld [vmem:[#allocation7 + $0xe0] sm:$0xff]  ;;  %v249_v58 = vld [vmem:[#allocation7 + $0xe8] sm:$0xff] }
  0x43   :  { %510 = vmatmul.mubr.msk.f32.vlgmr.msra.gmra.mrb[0].mxu0 %vm68_vm1, %v57_v17  ;;  %647 = vmatprep.subr.bf16.mxu0 %v809_v0  ;;  %v663_v56 = vpack.c.bf16 %v247_v55, %v246_v54  ;;  %v666_v59 = vpack.c.bf16 %v249_v58, %v248_v57  ;;  %v250_v60 = vld [vmem:[#allocation7 + $0xf0] sm:$0xff]  ;;  %v251_v61 = vld [vmem:[#allocation7 + $0xf8] sm:$0xff]  ;;  %v329_v63 = vld [vmem:[#allocation7 + $0x100] sm:$0xff] }
  0x44   :  { %631 = vmatpush3.bf16.msra.mxu1 %v630_v18  ;;  %579 = vmatprep.mubr.msk.f32.mxu0 %vm810_vm0, %v811_v1  ;;  %v669_v62 = vpack.c.bf16 %v251_v61, %v250_v60  ;;  %v330_v2 = vld [vmem:[#allocation7 + $0x108] sm:$0xff]  ;;  %v331_v3 = vld [vmem:[#allocation7 + $0x110] sm:$0xff]  ;;  %v332_v4 = vld [vmem:[#allocation7 + $0x118] sm:$0xff] }
  0x45   :  { %632 = vmatprep.subr.bf16.mxu1 %v809_v0  ;;  %649 = vmatpush3.bf16.msra.mxu0 %v648_v37  ;;  %v675_v5 = vpack.c.bf16 %v332_v4, %v331_v3  ;;  %v333_v6 = vld [vmem:[#allocation7 + $0x120] sm:$0xff]  ;;  %v334_v7 = vld [vmem:[#allocation7 + $0x128] sm:$0xff]  ;;  %v335_v9 = vld [vmem:[#allocation7 + $0x130] sm:$0xff] }
  0x46   :  { %650 = vmatprep.subr.bf16.mxu0 %v809_v0  ;;  %v678_v8 = vpack.c.bf16 %v334_v7, %v333_v6  ;;  %v336_v10 = vld [vmem:[#allocation7 + $0x138] sm:$0xff]  ;;  %v337_v12 = vld [vmem:[#allocation7 + $0x140] sm:$0xff]  ;;  %v338_v13 = vld [vmem:[#allocation7 + $0x148] sm:$0xff] }
  0x47   :  { %v681_v11 = vpack.c.bf16 %v336_v10, %v335_v9  ;;  %v684_v14 = vpack.c.bf16 %v338_v13, %v337_v12  ;;  %v439_v15 = vld [vmem:[%s942_s3 + $0x1] ss:$0 sm:$0xff]  ;;  %v341_v23 = vld [vmem:[#allocation7 + $0x160] sm:$0xff]  ;;  %v440_v29 = vld [vmem:[%s942_s3 + $0x2] ss:$0 sm:$0xff] }
  0x48   :  { %634 = vmatpush3.bf16.msra.mxu1 %v633_v21  ;;  %v339_v20 = vld [vmem:[#allocation7 + $0x150] sm:$0xff]  ;;  %v340_v21 = vld [vmem:[#allocation7 + $0x158] sm:$0xff] }
  0x49   :  { %635 = vmatprep.subr.bf16.mxu1 %v809_v0  ;;  %652 = vmatpush3.bf16.msra.mxu0 %v651_v39  ;;  %v687_v22 = vpack.c.bf16 %v340_v21, %v339_v20  ;;  %v343_v26 = vld [vmem:[#allocation7 + $0x170] sm:$0xff] }
  0x4a   :  { %653 = vmatprep.subr.bf16.mxu0 %v809_v0  ;;  %v441_v34 = vld [vmem:[%s942_s3 + $0x3] ss:$0 sm:$0xff] }
  0x4c   :  { %637 = vmatpush3.bf16.msra.mxu1 %v636_v24  ;;  %v342_v24 = vld [vmem:[#allocation7 + $0x168] sm:$0xff] }
  0x4d   :  { %638 = vmatprep.subr.bf16.mxu1 %v809_v0  ;;  %655 = vmatpush3.bf16.msra.mxu0 %v654_v42  ;;  %v690_v25 = vpack.c.bf16 %v342_v24, %v341_v23 }
  0x4e   :  { %656 = vmatprep.subr.bf16.mxu0 %v809_v0 }
  0x50   :  { %640 = vmatpush3.bf16.msra.mxu1 %v639_v27  ;;  %v344_v27 = vld [vmem:[#allocation7 + $0x178] sm:$0xff] }
  0x51   :  { %641 = vmatprep.subr.bf16.mxu1 %v809_v0  ;;  %658 = vmatpush3.bf16.msra.mxu0 %v657_v45  ;;  %v693_v28 = vpack.c.bf16 %v344_v27, %v343_v26 }
  0x52   :  { %659 = vmatprep.subr.bf16.mxu0 %v809_v0 }
  0x54   :  { %643 = vmatpush3.bf16.msra.mxu1 %v642_v30 }
  0x55   :  { %644 = vmatprep.subr.bf16.mxu1 %v809_v0  ;;  %661 = vmatpush3.bf16.msra.mxu0 %v660_v48 }
  0x56   :  { %662 = vmatprep.subr.bf16.mxu0 %v809_v0 }
  0x58   :  { %646 = vmatpush3.bf16.msra.mxu1 %v645_v33 }
  0x59   :  { %671 = vmatprep.subr.bf16.mxu1 %v809_v0  ;;  %664 = vmatpush3.bf16.msra.mxu0 %v663_v56 }
  0x5a   :  { %665 = vmatprep.subr.bf16.mxu0 %v809_v0 }
  0x5d   :  { %667 = vmatpush3.bf16.msra.mxu0 %v666_v59 }
  0x5e   :  { %668 = vmatprep.subr.bf16.mxu0 %v809_v0 }
  0x61   :  { %670 = vmatpush3.bf16.msra.mxu0 %v669_v62 }
 0x116   :  { %v138_v50 = vpop.f32.mrb[0].mxu0 }
 0x117   :  { %v139_v51 = vadd.f32 %v437_v49, %v138_v50  ;;  %v511_v52 = vpop.f32.mrb[1].mxu0 }
 0x119   :  { %704 = vtanh.f32 %v139_v51 }
 0x123   :  { %v705_v53 = vpop.eup %704 }
 0x124   :  { %545 = vmatmul.mubr.f32.vlgmr.msra.gmra.mrb[0].mxu1 %v705_v53 }
 0x125   :  { %614 = vmatprep.mubr.msk.f32.mxu1 %vm810_vm0, %v811_v1  ;;  %v672_v1 = vpack.c.bf16 %v330_v2, %v329_v63 }
 0x127   :  { %673 = vmatpush3.bf16.msra.mxu1 %v672_v1 }
 0x128   :  { %674 = vmatprep.subr.bf16.mxu1 %v809_v0 }
 0x12b   :  { %676 = vmatpush3.bf16.msra.mxu1 %v675_v5 }
 0x12c   :  { %677 = vmatprep.subr.bf16.mxu1 %v809_v0 }
 0x12f   :  { %679 = vmatpush3.bf16.msra.mxu1 %v678_v8 }
 0x130   :  { %680 = vmatprep.subr.bf16.mxu1 %v809_v0 }
 0x133   :  { %682 = vmatpush3.bf16.msra.mxu1 %v681_v11 }
 0x134   :  { %683 = vmatprep.subr.bf16.mxu1 %v809_v0 }
 0x137   :  { %685 = vmatpush3.bf16.msra.mxu1 %v684_v14 }
 0x138   :  { %686 = vmatprep.subr.bf16.mxu1 %v809_v0 }
 0x13b   :  { %688 = vmatpush3.bf16.msra.mxu1 %v687_v22 }
 0x13c   :  { %689 = vmatprep.subr.bf16.mxu1 %v809_v0 }
 0x13f   :  { %691 = vmatpush3.bf16.msra.mxu1 %v690_v25 }
 0x140   :  { %692 = vmatprep.subr.bf16.mxu1 %v809_v0 }
 0x143   :  { %694 = vmatpush3.bf16.msra.mxu1 %v693_v28 }
 0x1f7   :  { %v230_v16 = vpop.f32.mrb[0].mxu1 }
 0x1f8   :  { %v231_v17 = vadd.f32 %v439_v15, %v230_v16  ;;  %v546_v18 = vpop.f32.mrb[1].mxu1 }
 0x1fa   :  { %706 = vtanh.f32 %v231_v17 }
 0x204   :  { %v707_v19 = vpop.eup %706 }
 0x205   :  { %580 = vmatmul.mubr.f32.vlgmr.msra.gmra.mrb[2].mxu0 %v707_v19 }
 0x2d8   :  { %v323_v30 = vpop.f32.mrb[2].mxu0 }
 0x2d9   :  { %v324_v31 = vadd.f32 %v440_v29, %v323_v30  ;;  %v581_v32 = vpop.f32.mrb[3].mxu0 }
 0x2db   :  { %708 = vtanh.f32 %v324_v31 }
 0x2e5   :  { %v709_v33 = vpop.eup %708 }
 0x2e6   :  { %615 = vmatmul.mubr.f32.vlgmr.msra.gmra.mrb[2].mxu1 %v709_v33 }
 0x3b9   :  { %v416_v35 = vpop.f32.mrb[2].mxu1 }
 0x3ba   :  { %v417_v36 = vadd.f32 %v441_v34, %v416_v35  ;;  %v616_v0 = vpop.f32.mrb[3].mxu1 }
 0x3bc   :  { %420 = vst [vmem:[#allocation8] sm:$0xff] %v417_v36 }
 0x3bd   :  { %787 = shalt.err (!%p784_p0)
}
 0x3be   :  { %s788_s11 = scalar_lea.hbm %s943_s4, 128 }
 0x3bf   :  { %p789_p1 = scmp.ne.s32.totalorder %s943_s4, %s788_s11  ;;  %p792_p2 = scmp.lt.u32.totalorder %s788_s11, %s943_s4 }
 0x3c1   :  { %p794_p3 = pnand %p792_p2, %p789_p1 }
 0x3c3   :  { %797 = shalt.err (!%p794_p3)
}
 0x3c4   :  { %430 = dma.vmem_to_hbm [thread:$0]  %s428_s7, 128, %s943_s4, [#allocation4]  }
 0x3c5   :  { %802 = dma.done.wait [#allocation4], 128  }
 0x3c6   :  { %803 = vsyncadd [#allocation4], 4294967168 }
 0x3c7   :  { %434 = vsyncpa [#allocation3], 1 }
 0x3c8   :  { %435 = vsyncpa [#allocation6], 1 }
 0x3c9   :  { %436 = vsyncpa [#allocation4], 1 }

</bundles_post_ra>
